<compile_context>
chip_gen: v5e
topology: v5e:2x2
jax: 0.10.0
libtpu: 0.0.40
codegen_flags: <defaults>
</compile_context>

<pallas_src>
import functools

import jax
import jax.numpy as jnp
from jax import lax
from jax.experimental import pallas as pl
from jax.experimental.pallas import tpu as pltpu

_LANE = 128


def _round_up(v, m):
    return (v + m - 1) // m * m


# ---------------------------------------------------------------------------
# Small-feature-map path: one grid step handles NB whole images.
# ---------------------------------------------------------------------------
def _ca_small_kernel(x_ref, w1t_ref, w2_ref, o_ref, *, hw, inv_hw):
    x = x_ref[...].astype(jnp.float32)                       # (NB, C, HW)

    if hw % _LANE != 0:
        # Insurance mask for the physically padded lanes of an unaligned HW.
        col = lax.broadcasted_iota(jnp.int32, x.shape, 2)
        inb = col < hw
        x_sum_in = jnp.where(inb, x, 0.0)
        x_max_in = jnp.where(inb, x, -jnp.inf)
    else:
        x_sum_in = x
        x_max_in = x

    pooled_sum = jnp.sum(x_sum_in, axis=-1, keepdims=True)   # (NB, C, 1)
    pooled_max = jnp.max(x_max_in, axis=-1, keepdims=True)   # (NB, C, 1)

    w1t = w1t_ref[...]                                       # (C, CRP)
    w2 = w2_ref[...]                                         # (C, CRP)

    def mlp(v):                                              # v: (NB, C, 1)
        h = jnp.sum(w1t[None, :, :] * v, axis=1, keepdims=True)   # (NB,1,CRP)
        h = jnp.maximum(h, 0.0)                                    # ReLU
        return jnp.sum(w2[None, :, :] * h, axis=2, keepdims=True)  # (NB,C,1)

    pre = mlp(pooled_sum * inv_hw) + mlp(pooled_max)
    o_ref[...] = 1.0 / (1.0 + jnp.exp(-pre))                 # sigmoid


# ---------------------------------------------------------------------------
# Big-feature-map path: tiled spatial reduction with (C,128) partial
# accumulators, tail masking gated to the last step only.
# ---------------------------------------------------------------------------
def _ca_big_kernel(x_ref, w1t_ref, w2_ref, o_ref, sum_ref, max_ref,
                   *, hw, ts, inv_hw):
    s = pl.program_id(1)
    last = pl.num_programs(1) - 1

    @pl.when(s == 0)
    def _init():
        sum_ref[...] = jnp.zeros_like(sum_ref)
        max_ref[...] = jnp.full_like(max_ref, -jnp.inf)

    xt = x_ref[0].astype(jnp.float32)                        # (C, TS)
    nchunks = ts // _LANE

    def accumulate(x_for_sum, x_for_max):
        # Pure VPU adds/maxes of 128-lane chunks into (C, 128) accumulators;
        # the cross-lane reduce is deferred to the epilogue.
        psum = x_for_sum[:, 0:_LANE]
        pmax = x_for_max[:, 0:_LANE]
        for k in range(1, nchunks):
            sl = slice(k * _LANE, (k + 1) * _LANE)
            psum = psum + x_for_sum[:, sl]
            pmax = jnp.maximum(pmax, x_for_max[:, sl])
        sum_ref[...] += psum
        max_ref[...] = jnp.maximum(max_ref[...], pmax)

    tail_valid = hw % ts                                     # static python int
    if tail_valid == 0:
        accumulate(xt, xt)
    else:
        @pl.when(s != last)
        def _interior():                                     # no masking cost
            accumulate(xt, xt)

        @pl.when(s == last)
        def _tail():                                         # masked tail tile
            col = lax.broadcasted_iota(jnp.int32, xt.shape, 1)
            inb = col < tail_valid
            accumulate(jnp.where(inb, xt, 0.0),
                       jnp.where(inb, xt, -jnp.inf))

    @pl.when(s == last)
    def _epilogue():
        pooled_sum = jnp.sum(sum_ref[...], axis=-1, keepdims=True)   # (C, 1)
        pooled_max = jnp.max(max_ref[...], axis=-1, keepdims=True)   # (C, 1)
        w1t = w1t_ref[...]                                           # (C, CRP)
        w2 = w2_ref[...]                                             # (C, CRP)

        def mlp(v):                                                  # v: (C,1)
            h = jnp.sum(w1t * v, axis=0, keepdims=True)              # (1, CRP)
            h = jnp.maximum(h, 0.0)
            return jnp.sum(w2 * h, axis=1, keepdims=True)            # (C, 1)

        pre = mlp(pooled_sum * inv_hw) + mlp(pooled_max)
        o_ref[0] = 1.0 / (1.0 + jnp.exp(-pre))


# ---------------------------------------------------------------------------
# Wrapper
# ---------------------------------------------------------------------------
def channel_attention_pallas(x, fc1_w, fc2_w, *,
                             x_tile_budget_bytes=4 << 20,
                             small_path_budget_bytes=4 << 20,
                             batch_fold_cap=8):
    """x: (N, C, H, W) f32 or bf16; fc1_w: (C//r, C, 1, 1); fc2_w: (C, C//r, 1, 1)."""
    n, c, h, w = x.shape
    cr = fc1_w.shape[0]
    assert c % 8 == 0, "channel count must be a multiple of 8 (sublane tiling)"
    hw = h * w
    itemsize = x.dtype.itemsize

    # Fold the 1x1 convs into (C, CRP) matrices, zero-padded on the hidden dim
    # (zero rows/cols contribute exactly nothing -> results stay exact).
    crp = max(8, _round_up(cr, 8))
    w1t = jnp.zeros((c, crp), jnp.float32).at[:, :cr].set(
        fc1_w.reshape(cr, c).T.astype(jnp.float32))
    w2 = jnp.zeros((c, crp), jnp.float32).at[:, :cr].set(
        fc2_w.reshape(c, cr).astype(jnp.float32))

    xf = x.reshape(n, c, hw)               # free reshape (merges trailing dims)
    w_bytes = 2 * c * crp * 4
    img_bytes = c * hw * itemsize

    # -------- small-map path: fold NB whole images per grid step -----------
    if img_bytes <= small_path_budget_bytes:
        nb = max(1, min(n, batch_fold_cap,
                        max(1, x_tile_budget_bytes // img_bytes)))
        while n % nb:                       # divisor of N -> no batch padding
            nb -= 1
        block_bytes = nb * img_bytes
        vmem_limit = int(min(max(6 * block_bytes + 4 * w_bytes + (4 << 20),
                                 24 << 20), 56 << 20))
        kernel = functools.partial(_ca_small_kernel, hw=hw, inv_hw=1.0 / hw)
        out = pl.pallas_call(
            kernel,
            out_shape=jax.ShapeDtypeStruct((n, c, 1), jnp.float32),
            grid_spec=pltpu.PrefetchScalarGridSpec(
                num_scalar_prefetch=0,
                grid=(n // nb,),
                in_specs=[
                    pl.BlockSpec((nb, c, hw), lambda i: (i, 0, 0)),
                    pl.BlockSpec((c, crp), lambda i: (0, 0)),     # VMEM-resident
                    pl.BlockSpec((c, crp), lambda i: (0, 0)),     # VMEM-resident
                ],
                out_specs=pl.BlockSpec((nb, c, 1), lambda i: (i, 0, 0)),
            ),
            compiler_params=pltpu.CompilerParams(
                dimension_semantics=("parallel",),
                vmem_limit_bytes=vmem_limit),
        )(xf, w1t, w2)
        return out.reshape(n, c, 1, 1)

    # -------- big-map path: tiled spatial reduction -------------------------
    budget_ts = max(_LANE,
                    (x_tile_budget_bytes // (c * itemsize)) // _LANE * _LANE)
    ts = min(_round_up(hw, _LANE), budget_ts, 128 * _LANE)
    nsteps = -(-hw // ts)                   # ceil-div; ragged tail masked in-kernel
    block_bytes = c * ts * itemsize
    f32_tile = c * ts * 4
    vmem_limit = int(min(max(2 * block_bytes + 3 * f32_tile + 4 * w_bytes
                             + 2 * c * _LANE * 4 + (4 << 20),
                             24 << 20), 56 << 20))

    kernel = functools.partial(_ca_big_kernel, hw=hw, ts=ts, inv_hw=1.0 / hw)
    out = pl.pallas_call(
        kernel,
        out_shape=jax.ShapeDtypeStruct((n, c, 1), jnp.float32),
        grid_spec=pltpu.PrefetchScalarGridSpec(
            num_scalar_prefetch=0,
            grid=(n, nsteps),                     # reduction axis LAST (required)
            in_specs=[
                pl.BlockSpec((1, c, ts), lambda i, s: (i, 0, s)),
                pl.BlockSpec((c, crp), lambda i, s: (0, 0)),      # VMEM-resident
                pl.BlockSpec((c, crp), lambda i, s: (0, 0)),      # VMEM-resident
            ],
            out_specs=pl.BlockSpec((1, c, 1), lambda i, s: (i, 0, 0)),
            scratch_shapes=[pltpu.VMEM((c, _LANE), jnp.float32),  # partial sum
                            pltpu.VMEM((c, _LANE), jnp.float32)], # partial max
        ),
        compiler_params=pltpu.CompilerParams(
            dimension_semantics=("parallel", "arbitrary"),
            vmem_limit_bytes=vmem_limit),
    )(xf, w1t, w2)
    return out.reshape(n, c, 1, 1)


# ---------------------------- pure-JAX reference ----------------------------
def channel_attention_reference(x, fc1_w, fc2_w):
    n, c, h, w = x.shape
    cr = fc1_w.shape[0]
    hi = lax.Precision.HIGHEST
    avg = jnp.mean(x.astype(jnp.float32), axis=(2, 3))       # (N, C)
    mx = jnp.max(x.astype(jnp.float32), axis=(2, 3))         # (N, C)
    w1 = fc1_w.reshape(cr, c).astype(jnp.float32)
    w2 = fc2_w.reshape(c, cr).astype(jnp.float32)

    def mlp(v):
        hid = jnp.maximum(jnp.dot(v, w1.T, precision=hi), 0.0)
        return jnp.dot(hid, w2.T, precision=hi)

    out = jax.nn.sigmoid(mlp(avg) + mlp(mx))
    return out.reshape(n, c, 1, 1)


# ---------------------------- main ----------------------------
if __name__ == "__main__":
    key = jax.random.PRNGKey(0)
    ks = jax.random.split(key, 9)

    def check(out, ref, tol=2e-3):
        err = float(jnp.max(jnp.abs(out - ref)))
        assert bool(jnp.allclose(out, ref, atol=tol, rtol=tol)), err

    # Case 1: small-map path, batch folding (N=2 per step), aligned HW.
    n, c, h, w, ratio = 2, 64, 16, 16, 16
    x = jax.random.normal(ks[0], (n, c, h, w), jnp.float32)
    fc1_w = 0.125 * jax.random.normal(ks[1], (c // ratio, c, 1, 1), jnp.float32)
    fc2_w = 0.5 * jax.random.normal(ks[2], (c, c // ratio, 1, 1), jnp.float32)
    out = jax.block_until_ready(channel_attention_pallas(x, fc1_w, fc2_w))
    assert out.shape == (n, c, 1, 1)
    check(out, channel_attention_reference(x, fc1_w, fc2_w))

    # Case 2: small-map path, non-lane-aligned spatial (10x10), N=3 folded.
    n2, c2, h2, w2 = 3, 32, 10, 10
    x2 = jax.random.normal(ks[3], (n2, c2, h2, w2), jnp.float32)
    fc1_w2 = 0.2 * jax.random.normal(ks[4], (c2 // 16, c2, 1, 1), jnp.float32)
    fc2_w2 = 0.5 * jax.random.normal(ks[5], (c2, c2 // 16, 1, 1), jnp.float32)
    out2 = jax.block_until_ready(channel_attention_pallas(x2, fc1_w2, fc2_w2))
    check(out2, channel_attention_reference(x2, fc1_w2, fc2_w2))

    # Case 3: force the big (tiled-reduction) path with a ragged tail tile.
    n3, c3, h3, w3 = 2, 64, 24, 20          # hw = 480 -> 2 steps of 256, tail 224
    x3 = jax.random.normal(ks[6], (n3, c3, h3, w3), jnp.float32)
    fc1_w3 = 0.2 * jax.random.normal(ks[7], (c3 // 16, c3, 1, 1), jnp.float32)
    fc2_w3 = 0.5 * jax.random.normal(ks[8], (c3, c3 // 16, 1, 1), jnp.float32)
    out3 = jax.block_until_ready(channel_attention_pallas(
        x3, fc1_w3, fc2_w3,
        small_path_budget_bytes=0, x_tile_budget_bytes=64 * 1024))
    check(out3, channel_attention_reference(x3, fc1_w3, fc2_w3))

    # Case 4: bf16 activations stream at native width (halved HBM traffic).
    xb = x.astype(jnp.bfloat16)
    out4 = jax.block_until_ready(channel_attention_pallas(xb, fc1_w, fc2_w))
    check(out4, channel_attention_reference(xb, fc1_w, fc2_w))

    print("KERNEL_OK")
</pallas_src>

<mosaic_0001>
module attributes {stable_mosaic.version = 11 : i64} {
  func.func @_ca_small_kernel(%arg0: i32, %arg1: memref<2x64x256xf32, #tpu.memory_space<vmem>>, %arg2: memref<64x8xf32, #tpu.memory_space<vmem>>, %arg3: memref<64x8xf32, #tpu.memory_space<vmem>>, %arg4: memref<2x64x1xf32, #tpu.memory_space<vmem>>) attributes {dimension_semantics = [#tpu.dimension_semantics<parallel>], iteration_bounds = array<i64: 1>, scalar_prefetch = 0 : i64, scratch_operands = 0 : i64, tpu.core_type = #tpu.core_type<tc>, window_params = [{transform_indices = @transform_0, window_bounds = array<i64: 2, 64, 256>}, {pipeline_mode = #tpu.pipeline_mode<synchronous>, transform_indices = @transform_1, window_bounds = array<i64: 64, 8>}, {pipeline_mode = #tpu.pipeline_mode<synchronous>, transform_indices = @transform_2, window_bounds = array<i64: 64, 8>}, {transform_indices = @transform_3, window_bounds = array<i64: 2, 64, 1>}]} {
    %c0 = arith.constant 0 : index
    %c0_0 = arith.constant 0 : index
    %c0_1 = arith.constant 0 : index
    %0 = vector.load %arg1[%c0, %c0_0, %c0_1] : memref<2x64x256xf32, #tpu.memory_space<vmem>>, vector<2x64x256xf32>
    %cst = arith.constant dense<0.000000e+00> : vector<2x64xf32>
    %1 = vector.multi_reduction <add>, %0, %cst [2] : vector<2x64x256xf32> to vector<2x64xf32>
    %2 = vector.shape_cast %1 : vector<2x64xf32> to vector<2x64x1xf32>
    %cst_2 = arith.constant dense<0xFF800000> : vector<2x64xf32>
    %3 = vector.multi_reduction <maximumf>, %0, %cst_2 [2] : vector<2x64x256xf32> to vector<2x64xf32>
    %4 = vector.shape_cast %3 : vector<2x64xf32> to vector<2x64x1xf32>
    %c0_3 = arith.constant 0 : index
    %c0_4 = arith.constant 0 : index
    %5 = vector.load %arg2[%c0_3, %c0_4] : memref<64x8xf32, #tpu.memory_space<vmem>>, vector<64x8xf32>
    %c0_5 = arith.constant 0 : index
    %c0_6 = arith.constant 0 : index
    %6 = vector.load %arg3[%c0_5, %c0_6] : memref<64x8xf32, #tpu.memory_space<vmem>>, vector<64x8xf32>
    %cst_7 = arith.constant 3.906250e-03 : f32
    %7 = vector.broadcast %cst_7 : f32 to vector<2x64x1xf32>
    %8 = arith.mulf %2, %7 : vector<2x64x1xf32>
    %9 = vector.shape_cast %5 : vector<64x8xf32> to vector<1x64x8xf32>
    %10 = vector.broadcast %9 : vector<1x64x8xf32> to vector<2x64x8xf32>
    %11 = vector.broadcast %8 : vector<2x64x1xf32> to vector<2x64x8xf32>
    %12 = arith.mulf %10, %11 : vector<2x64x8xf32>
    %cst_8 = arith.constant dense<0.000000e+00> : vector<2x8xf32>
    %13 = vector.multi_reduction <add>, %12, %cst_8 [1] : vector<2x64x8xf32> to vector<2x8xf32>
    %14 = vector.shape_cast %13 : vector<2x8xf32> to vector<2x1x8xf32>
    %cst_9 = arith.constant 0.000000e+00 : f32
    %15 = vector.broadcast %cst_9 : f32 to vector<2x1x8xf32>
    %16 = arith.maximumf %14, %15 : vector<2x1x8xf32>
    %17 = vector.shape_cast %6 : vector<64x8xf32> to vector<1x64x8xf32>
    %18 = vector.broadcast %17 : vector<1x64x8xf32> to vector<2x64x8xf32>
    %19 = vector.broadcast %16 : vector<2x1x8xf32> to vector<2x64x8xf32>
    %20 = arith.mulf %18, %19 : vector<2x64x8xf32>
    %cst_10 = arith.constant dense<0.000000e+00> : vector<2x64xf32>
    %21 = vector.multi_reduction <add>, %20, %cst_10 [2] : vector<2x64x8xf32> to vector<2x64xf32>
    %22 = vector.shape_cast %21 : vector<2x64xf32> to vector<2x64x1xf32>
    %23 = vector.shape_cast %5 : vector<64x8xf32> to vector<1x64x8xf32>
    %24 = vector.broadcast %23 : vector<1x64x8xf32> to vector<2x64x8xf32>
    %25 = vector.broadcast %4 : vector<2x64x1xf32> to vector<2x64x8xf32>
    %26 = arith.mulf %24, %25 : vector<2x64x8xf32>
    %cst_11 = arith.constant dense<0.000000e+00> : vector<2x8xf32>
    %27 = vector.multi_reduction <add>, %26, %cst_11 [1] : vector<2x64x8xf32> to vector<2x8xf32>
    %28 = vector.shape_cast %27 : vector<2x8xf32> to vector<2x1x8xf32>
    %cst_12 = arith.constant 0.000000e+00 : f32
    %29 = vector.broadcast %cst_12 : f32 to vector<2x1x8xf32>
    %30 = arith.maximumf %28, %29 : vector<2x1x8xf32>
    %31 = vector.shape_cast %6 : vector<64x8xf32> to vector<1x64x8xf32>
    %32 = vector.broadcast %31 : vector<1x64x8xf32> to vector<2x64x8xf32>
    %33 = vector.broadcast %30 : vector<2x1x8xf32> to vector<2x64x8xf32>
    %34 = arith.mulf %32, %33 : vector<2x64x8xf32>
    %cst_13 = arith.constant dense<0.000000e+00> : vector<2x64xf32>
    %35 = vector.multi_reduction <add>, %34, %cst_13 [2] : vector<2x64x8xf32> to vector<2x64xf32>
    %36 = vector.shape_cast %35 : vector<2x64xf32> to vector<2x64x1xf32>
    %37 = arith.addf %22, %36 : vector<2x64x1xf32>
    %cst_14 = arith.constant 0.000000e+00 : f32
    %38 = vector.broadcast %cst_14 : f32 to vector<2x64x1xf32>
    %39 = arith.subf %38, %37 : vector<2x64x1xf32>
    %40 = math.exp %39 : vector<2x64x1xf32>
    %cst_15 = arith.constant 1.000000e+00 : f32
    %41 = vector.broadcast %cst_15 : f32 to vector<2x64x1xf32>
    %42 = arith.addf %41, %40 : vector<2x64x1xf32>
    %cst_16 = arith.constant 1.000000e+00 : f32
    %43 = vector.broadcast %cst_16 : f32 to vector<2x64x1xf32>
    %44 = arith.divf %43, %42 : vector<2x64x1xf32>
    %c0_17 = arith.constant 0 : index
    %c0_18 = arith.constant 0 : index
    %c0_19 = arith.constant 0 : index
    %45 = vector.load %arg4[%c0_17, %c0_18, %c0_19] : memref<2x64x1xf32, #tpu.memory_space<vmem>>, vector<2x64x1xf32>
    tpu.vector_store %arg4[%c0_17, %c0_18, %c0_19], %44 {strides = array<i32>} : memref<2x64x1xf32, #tpu.memory_space<vmem>>, vector<2x64x1xf32>,
    return
  }
  func.func @transform_0(%arg0: i32) -> (i32, i32, i32) {
    %c0_i32 = arith.constant 0 : i32
    %c0_i32_0 = arith.constant 0 : i32
    %c0_i32_1 = arith.constant 0 : i32
    return %arg0, %c0_i32, %c0_i32_0 : i32, i32, i32
  }
  func.func @transform_1(%arg0: i32) -> (i32, i32) {
    %c0_i32 = arith.constant 0 : i32
    %c0_i32_0 = arith.constant 0 : i32
    %c0_i32_1 = arith.constant 0 : i32
    return %c0_i32, %c0_i32_0 : i32, i32
  }
  func.func @transform_2(%arg0: i32) -> (i32, i32) {
    %c0_i32 = arith.constant 0 : i32
    %c0_i32_0 = arith.constant 0 : i32
    %c0_i32_1 = arith.constant 0 : i32
    return %c0_i32, %c0_i32_0 : i32, i32
  }
  func.func @transform_3(%arg0: i32) -> (i32, i32, i32) {
    %c0_i32 = arith.constant 0 : i32
    %c0_i32_0 = arith.constant 0 : i32
    %c0_i32_1 = arith.constant 0 : i32
    return %arg0, %c0_i32, %c0_i32_0 : i32, i32, i32
  }
}

</mosaic_0001>

<bundles_post_ra>
// kernel: tpu_custom_call.1
= control target key start
LH: loop header
LB: loop body
LE: loop exit
PB: predicated region body
PF: predicated region fallthrough
CT: control target
= control target key end

     0   :  { %8 = vsyncpa [#allocation3], 0  ;;  %s874_s15 = smov [#allocation2]   ;;  %s875_s17 = smov 256   ;;  %s1433_s0 = inlined_call_operand.hbm [shape: f32[2,64,256], index: 0, kind: input, shape index: {}]   ;;  %s1434_s1 = inlined_call_operand.vmem [shape: f32[64,8], index: 1, kind: input, shape index: {}]   ;;  %s1435_s2 = inlined_call_operand.vmem [shape: f32[64,8], index: 2, kind: input, shape index: {}]   ;;  %s1436_s3 = inlined_call_operand.vmem [shape: f32[2,64,1], index: 3, kind: output, shape index: {}]  }
   0x1   :  { %s13_s14 = sshll.u32 %s1433_s0, 4  ;;  %s15_s16 = sshll.u32 %s874_s15, 4  ;;  %s14_s14 = int_to_ptr.hbm [resolvable:$true] %s13_s14  ;;  %s16_s16 = int_to_ptr.vmem [resolvable:$true] %s15_s16 }
   0x2   :  { %s876_s18 = smov 16  }
   0x3   :  { %21 = dma.hbm_to_vmem [thread:$0]  %s14_s14, 4096, %s16_s16, [#allocation3], %s875_s17, %s875_s17, %s876_s18  }
   0x4   :  { %872 = dma.done.wait [#allocation3], 4096  }
   0x5   :  { %873 = vsyncadd [#allocation3], 4294963200  ;;  %v900_v0 = vld [vmem:[#allocation2 + $0x40] sm:$0xff]  ;;  %v902_v1 = vld [vmem:[#allocation2 + $0x48] sm:$0xff]  ;;  %vm206_vm0 = vcmask 64512   ;;  %vm759_vm1 = vcmask 7168  }
   0x6   :  { %v904_v2 = vld [vmem:[#allocation2 + $0x20] sm:$0xff]  ;;  %v74_v3 = vadd.f32 %v902_v1, %v900_v0  ;;  %v908_v4 = vld [vmem:[#allocation2 + $0x28] sm:$0xff]  ;;  %v912_v9 = vld [vmem:[#allocation2 + $0x50] sm:$0xff]  ;;  %v122_v45 = vmax.f32 %v900_v0, %v902_v1 }
   0x7   :  { %v30_v5 = vld [vmem:[#allocation2] sm:$0xff]  ;;  %v31_v6 = vld [vmem:[#allocation2 + $0x8] sm:$0xff]  ;;  %v68_v7 = vadd.f32 %v908_v4, %v904_v2  ;;  %v914_v10 = vld [vmem:[#allocation2 + $0x58] sm:$0xff]  ;;  %v116_v51 = vmax.f32 %v904_v2, %v908_v4 }
   0x8   :  { %v62_v8 = vadd.f32 %v31_v6, %v30_v5  ;;  %75 = vadd.xlane.f32.xlu2 %v74_v3  ;;  %v916_v11 = vld [vmem:[#allocation2 + $0x30] sm:$0xff]  ;;  %v918_v12 = vld [vmem:[#allocation2 + $0x38] sm:$0xff]  ;;  %v77_v15 = vadd.f32 %v914_v10, %v912_v9  ;;  %v46_v18 = vld [vmem:[#allocation2 + $0x80] sm:$0xff]  ;;  %v110_v49 = vmax.f32 %v30_v5, %v31_v6  ;;  %v125_v58 = vmax.f32 %v912_v9, %v914_v10 }
   0x9   :  { %69 = vadd.xlane.f32.xlu1 %v68_v7  ;;  %v32_v13 = vld [vmem:[#allocation2 + $0x10] sm:$0xff]  ;;  %v33_v14 = vld [vmem:[#allocation2 + $0x18] sm:$0xff]  ;;  %v71_v16 = vadd.f32 %v918_v12, %v916_v11  ;;  %v47_v19 = vld [vmem:[#allocation2 + $0x88] sm:$0xff]  ;;  %v119_v56 = vmax.f32 %v916_v11, %v918_v12 }
   0xa   :  { %63 = vadd.xlane.f32.xlu0 %v62_v8  ;;  %v65_v17 = vadd.f32 %v33_v14, %v32_v13  ;;  %v924_v20 = vld [vmem:[#allocation2 + $0x70] sm:$0xff]  ;;  %v926_v21 = vld [vmem:[#allocation2 + $0x78] sm:$0xff]  ;;  %v928_v22 = vld [vmem:[#allocation2 + $0x60] sm:$0xff]  ;;  %v86_v24 = vadd.f32 %v47_v19, %v46_v18  ;;  %v113_v48 = vmax.f32 %v32_v13, %v33_v14  ;;  %v134_v53 = vmax.f32 %v46_v18, %v47_v19 }
   0xb   :  { %v43_v23 = vld [vmem:[#allocation2 + $0x68] sm:$0xff]  ;;  %v83_v25 = vadd.f32 %v926_v21, %v924_v20  ;;  %v52_v27 = vld [vmem:[#allocation2 + $0xb0] sm:$0xff]  ;;  %v53_v28 = vld [vmem:[#allocation2 + $0xb8] sm:$0xff]  ;;  %v131_v54 = vmax.f32 %v924_v20, %v926_v21 }
   0xc   :  { %v80_v26 = vadd.f32 %v43_v23, %v928_v22  ;;  %v50_v29 = vld [vmem:[#allocation2 + $0xa0] sm:$0xff]  ;;  %v51_v30 = vld [vmem:[#allocation2 + $0xa8] sm:$0xff]  ;;  %v48_v31 = vld [vmem:[#allocation2 + $0x90] sm:$0xff]  ;;  %v95_v33 = vadd.f32 %v53_v28, %v52_v27  ;;  %v143_v55 = vmax.f32 %v52_v27, %v53_v28  ;;  %v128_v61 = vmax.f32 %v928_v22, %v43_v23 }
   0xd   :  { %v49_v32 = vld [vmem:[#allocation2 + $0x98] sm:$0xff]  ;;  %v92_v34 = vadd.f32 %v51_v30, %v50_v29  ;;  %v58_v36 = vld [vmem:[#allocation2 + $0xe0] sm:$0xff]  ;;  %v59_v37 = vld [vmem:[#allocation2 + $0xe8] sm:$0xff]  ;;  %v140_v57 = vmax.f32 %v50_v29, %v51_v30 }
   0xe   :  { %v89_v35 = vadd.f32 %v49_v32, %v48_v31  ;;  %v56_v38 = vld [vmem:[#allocation2 + $0xd0] sm:$0xff]  ;;  %v57_v39 = vld [vmem:[#allocation2 + $0xd8] sm:$0xff]  ;;  %v54_v40 = vld [vmem:[#allocation2 + $0xc0] sm:$0xff]  ;;  %v104_v42 = vadd.f32 %v59_v37, %v58_v36  ;;  %v137_v52 = vmax.f32 %v48_v31, %v49_v32  ;;  %v152_v60 = vmax.f32 %v58_v36, %v59_v37 }
   0xf   :  { %v55_v41 = vld [vmem:[#allocation2 + $0xc8] sm:$0xff]  ;;  %v101_v43 = vadd.f32 %v57_v39, %v56_v38  ;;  %v60_v46 = vld [vmem:[#allocation2 + $0xf0] sm:$0xff]  ;;  %v61_v47 = vld [vmem:[#allocation2 + $0xf8] sm:$0xff]  ;;  %v149_v62 = vmax.f32 %v56_v38, %v57_v39 }
  0x10   :  { %78 = vadd.xlane.f32.xlu2 %v77_v15  ;;  %v98_v44 = vadd.f32 %v55_v41, %v54_v40  ;;  %v107_v50 = vadd.f32 %v61_v47, %v60_v46  ;;  %v146_v59 = vmax.f32 %v54_v40, %v55_v41  ;;  %v155_v63 = vmax.f32 %v60_v46, %v61_v47  ;;  %v947_v4 = vld [vmem:[%s1434_s1] sm:$0xff]  ;;  %v952_v7 = vld [vmem:[%s1434_s1 + $0x10] sm:$0xff]  ;;  %v957_v8 = vld [vmem:[%s1434_s1 + $0x18] sm:$0xff] }
  0x11   :  { %72 = vadd.xlane.f32.xlu1 %v71_v16  ;;  %v962_v10 = vld [vmem:[%s1434_s1 + $0x8] sm:$0xff]  ;;  %v968_v16 = vld [vmem:[%s1434_s1 + $0x20] sm:$0xff]  ;;  %v987_v31 = vld [vmem:[%s1434_s1 + $0x38] sm:$0xff] }
  0x12   :  { %66 = vadd.xlane.f32.xlu0 %v65_v17  ;;  %v976_v21 = vld [vmem:[%s1434_s1 + $0x28] sm:$0xff] }
  0x18   :  { %87 = vadd.xlane.f32.xlu2 %v86_v24 }
  0x19   :  { %84 = vadd.xlane.f32.xlu1 %v83_v25 }
  0x1a   :  { %81 = vadd.xlane.f32.xlu0 %v80_v26 }
  0x20   :  { %96 = vadd.xlane.f32.xlu2 %v95_v33  ;;  %v992_v33 = vld [vmem:[%s1434_s1 + $0x30] sm:$0xff] }
  0x21   :  { %93 = vadd.xlane.f32.xlu1 %v92_v34 }
  0x22   :  { %90 = vadd.xlane.f32.xlu0 %v89_v35 }
  0x28   :  { %105 = vadd.xlane.f32.xlu2 %v104_v42 }
  0x29   :  { %102 = vadd.xlane.f32.xlu1 %v101_v43 }
  0x2a   :  { %99 = vadd.xlane.f32.xlu0 %v98_v44 }
  0x30   :  { %114 = vmax.xlane.f32.xlu2 %v113_v48 }
  0x31   :  { %111 = vmax.xlane.f32.xlu1 %v110_v49 }
  0x32   :  { %108 = vadd.xlane.f32.xlu0 %v107_v50 }
  0x38   :  { %117 = vmax.xlane.f32.xlu2 %v116_v51 }
  0x39   :  { %138 = vmax.xlane.f32.xlu1 %v137_v52 }
  0x3a   :  { %135 = vmax.xlane.f32.xlu0 %v134_v53 }
  0x40   :  { %144 = vmax.xlane.f32.xlu2 %v143_v55 }
  0x41   :  { %120 = vmax.xlane.f32.xlu1 %v119_v56 }
  0x42   :  { %141 = vmax.xlane.f32.xlu0 %v140_v57 }
  0x48   :  { %126 = vmax.xlane.f32.xlu2 %v125_v58 }
  0x49   :  { %147 = vmax.xlane.f32.xlu1 %v146_v59 }
  0x4a   :  { %123 = vmax.xlane.f32.xlu0 %v122_v45 }
  0x50   :  { %153 = vmax.xlane.f32.xlu2 %v152_v60 }
  0x51   :  { %129 = vmax.xlane.f32.xlu1 %v128_v61 }
  0x52   :  { %150 = vmax.xlane.f32.xlu0 %v149_v62 }
  0x59   :  { %156 = vmax.xlane.f32.xlu1 %v155_v63 }
  0x5a   :  { %132 = vmax.xlane.f32.xlu0 %v131_v54 }
  0x7b   :  { %v76_v0 = vpop.xlane.xlu2 %75 }
  0x7c   :  { %v70_v1 = vpop.xlane.xlu1 %69  ;;  %v178_v15 = vmul.f32 0.00390625, %v76_v0 }
  0x7d   :  { %v64_v2 = vpop.xlane.xlu0 %63  ;;  %v176_v5 = vmul.f32 0.00390625, %v70_v1 }
  0x7e   :  { %v174_v3 = vmul.f32 0.00390625, %v64_v2  ;;  %v194_v24 = vmul.f32 %v178_v15, %v968_v16 }
  0x7f   :  { %v192_v17 = vmul.f32 %v176_v5, %v952_v7 }
  0x80   :  { %v190_v12 = vmul.f32 %v174_v3, %v947_v4  ;;  %v214_v37 = vsel %vm206_vm0, %v194_v24, 0.0 }
  0x81   :  { %v210_v26 = vsel %vm206_vm0, %v192_v17, 0.0 }
  0x82   :  { %v207_v22 = vsel %vm206_vm0, %v190_v12, 0.0 }
  0x83   :  { %v79_v6 = vpop.xlane.xlu2 %78 }
  0x84   :  { %v73_v9 = vpop.xlane.xlu1 %72  ;;  %v179_v18 = vmul.f32 0.00390625, %v79_v6 }
  0x85   :  { %v67_v11 = vpop.xlane.xlu0 %66  ;;  %v177_v13 = vmul.f32 0.00390625, %v73_v9 }
  0x86   :  { %v175_v14 = vmul.f32 0.00390625, %v67_v11  ;;  %v195_v27 = vmul.f32 %v179_v18, %v976_v21 }
  0x87   :  { %v193_v19 = vmul.f32 %v177_v13, %v957_v8 }
  0x88   :  { %v191_v20 = vmul.f32 %v175_v14, %v962_v10  ;;  %v216_v39 = vsel %vm206_vm0, %v195_v27, 0.0 }
  0x89   :  { %v212_v28 = vsel %vm206_vm0, %v193_v19, 0.0 }
  0x8a   :  { %v208_v23 = vsel %vm206_vm0, %v191_v20, 0.0 }
  0x8b   :  { %v209_v25 = vadd.f32 %v208_v23, %v207_v22  ;;  %v88_v29 = vpop.xlane.xlu2 %87 }
  0x8c   :  { %v85_v32 = vpop.xlane.xlu1 %84  ;;  %v182_v40 = vmul.f32 0.00390625, %v88_v29 }
  0x8d   :  { %v211_v30 = vadd.f32 %v210_v26, %v209_v25  ;;  %v82_v34 = vpop.xlane.xlu0 %81  ;;  %v181_v35 = vmul.f32 0.00390625, %v85_v32 }
  0x8e   :  { %v180_v36 = vmul.f32 0.00390625, %v82_v34  ;;  %v198_v45 = vmul.f32 %v182_v40, %v947_v4 }
  0x8f   :  { %v213_v38 = vadd.f32 %v212_v28, %v211_v30  ;;  %v197_v41 = vmul.f32 %v181_v35, %v987_v31 }
  0x90   :  { %v196_v42 = vmul.f32 %v180_v36, %v992_v33  ;;  %v228_v56 = vsel %vm206_vm0, %v198_v45, 0.0 }
  0x91   :  { %v215_v43 = vadd.f32 %v214_v37, %v213_v38  ;;  %v220_v46 = vsel %vm206_vm0, %v197_v41, 0.0 }
  0x92   :  { %v218_v47 = vsel %vm206_vm0, %v196_v42, 0.0 }
  0x93   :  { %v217_v44 = vadd.f32 %v216_v39, %v215_v43  ;;  %v97_v48 = vpop.xlane.xlu2 %96 }
  0x94   :  { %v185_v50 = vmul.f32 0.00390625, %v97_v48  ;;  %v94_v51 = vpop.xlane.xlu1 %93 }
  0x95   :  { %v219_v49 = vadd.f32 %v218_v47, %v217_v44  ;;  %v91_v52 = vpop.xlane.xlu0 %90  ;;  %v184_v53 = vmul.f32 0.00390625, %v94_v51 }
  0x96   :  { %v183_v54 = vmul.f32 0.00390625, %v91_v52  ;;  %v201_v57 = vmul.f32 %v185_v50, %v957_v8 }
  0x97   :  { %v1001_v55 = vadd.f32 %v220_v46, %v219_v49  ;;  %v200_v58 = vmul.f32 %v184_v53, %v952_v7  ;;  %v1027_v49 = vld [vmem:[%s1435_s2 + $0x10] sm:$0xff] }
  0x98   :  { %v199_v59 = vmul.f32 %v183_v54, %v962_v10  ;;  %v233_v63 = vsel %vm206_vm0, %v201_v57, 0.0 }
  0x99   :  { %v231_v60 = vsel %vm206_vm0, %v200_v58, 0.0 }
  0x9a   :  { %v229_v61 = vsel %vm206_vm0, %v199_v59, 0.0  ;;  %v1042_v59 = vld [vmem:[%s1435_s2 + $0x28] sm:$0xff] }
  0x9b   :  { %v230_v62 = vadd.f32 %v229_v61, %v228_v56  ;;  %v106_v0 = vpop.xlane.xlu2 %105 }
  0x9c   :  { %v188_v2 = vmul.f32 0.00390625, %v106_v0  ;;  %v103_v3 = vpop.xlane.xlu1 %102 }
  0x9d   :  { %v232_v1 = vadd.f32 %v231_v60, %v230_v62  ;;  %v100_v5 = vpop.xlane.xlu0 %99  ;;  %v187_v6 = vmul.f32 0.00390625, %v103_v3 }
  0x9e   :  { %v186_v9 = vmul.f32 0.00390625, %v100_v5  ;;  %v204_v12 = vmul.f32 %v188_v2, %v992_v33 }
  0x9f   :  { %v234_v11 = vadd.f32 %v233_v63, %v232_v1  ;;  %v203_v13 = vmul.f32 %v187_v6, %v976_v21 }
  0xa0   :  { %v202_v14 = vmul.f32 %v186_v9, %v968_v16  ;;  %v239_v19 = vsel %vm206_vm0, %v204_v12, 0.0 }
  0xa1   :  { %v237_v15 = vsel %vm206_vm0, %v203_v13, 0.0 }
  0xa2   :  { %v235_v17 = vsel %vm206_vm0, %v202_v14, 0.0 }
  0xa3   :  { %v236_v18 = vadd.f32 %v235_v17, %v234_v11  ;;  %v115_v20 = vpop.xlane.xlu2 %114 }
  0xa4   :  { %v112_v23 = vpop.xlane.xlu1 %111  ;;  %v316_v44 = vmul.f32 %v962_v10, %v115_v20 }
  0xa5   :  { %v238_v22 = vadd.f32 %v237_v15, %v236_v18  ;;  %v109_v24 = vpop.xlane.xlu0 %108  ;;  %v315_v46 = vmul.f32 %v947_v4, %v112_v23 }
  0xa6   :  { %v189_v25 = vmul.f32 0.00390625, %v109_v24  ;;  %v332_v53 = vsel %vm206_vm0, %v316_v44, 0.0 }
  0xa7   :  { %v240_v26 = vadd.f32 %v239_v19, %v238_v22 }
  0xa8   :  { %v205_v27 = vmul.f32 %v189_v25, %v987_v31 }
  0xaa   :  { %v241_v28 = vsel %vm206_vm0, %v205_v27, 0.0 }
  0xab   :  { %v242_v29 = vadd.f32 %v241_v28, %v240_v26  ;;  %v118_v30 = vpop.xlane.xlu2 %117 }
  0xac   :  { %v139_v34 = vpop.xlane.xlu1 %138 }
  0xad   :  { %v243_v32 = vrot.slane %v242_v29, 4  ;;  %v136_v35 = vpop.xlane.xlu0 %135  ;;  %v324_v47 = vmul.f32 %v962_v10, %v139_v34  ;;  %v331_v10 = vsel %vm206_vm0, %v315_v46, 0.0 }
  0xae   :  { %v323_v48 = vmul.f32 %v947_v4, %v136_v35  ;;  %v317_v4 = vmul.f32 %v952_v7, %v118_v30 }
  0xaf   :  { %v244_v36 = vadd.f32 %v243_v32, %v242_v29  ;;  %v353_v57 = vsel %vm206_vm0, %v324_v47, 0.0 }
  0xb0   :  { %v352_v58 = vsel %vm206_vm0, %v323_v48, 0.0  ;;  %v334_v1 = vsel %vm206_vm0, %v317_v4, 0.0  ;;  %v1078_v4 = vld [vmem:[%s1435_s2] sm:$0xff] }
  0xb1   :  { %v245_v37 = vrot.slane %v244_v36, 2  ;;  %v354_v0 = vadd.f32 %v353_v57, %v352_v58 }
  0xb3   :  { %v246_v38 = vadd.f32 %v245_v37, %v244_v36  ;;  %v145_v39 = vpop.xlane.xlu2 %144 }
  0xb4   :  { %v121_v41 = vpop.xlane.xlu1 %120  ;;  %v326_v63 = vmul.f32 %v957_v8, %v145_v39 }
  0xb5   :  { %v247_v40 = vrot.slane %v246_v38, 1  ;;  %v142_v42 = vpop.xlane.xlu0 %141  ;;  %v318_v61 = vmul.f32 %v957_v8, %v121_v41 }
  0xb6   :  { %v325_v50 = vmul.f32 %v952_v7, %v142_v42  ;;  %v333_v7 = vadd.f32 %v332_v53, %v331_v10  ;;  %v357_v9 = vsel %vm206_vm0, %v326_v63, 0.0  ;;  %v1073_v10 = vld [vmem:[%s1435_s2 + $0x8] sm:$0xff]  ;;  %v222_v63 = vrot.slane %v1001_v55, 4 }
  0xb7   :  { %v248_v43 = vadd.f32 %v247_v40, %v246_v38  ;;  %v336_v6 = vsel %vm206_vm0, %v318_v61, 0.0 }
  0xb8   :  { %v355_v62 = vsel %vm206_vm0, %v325_v50, 0.0  ;;  %v335_v12 = vadd.f32 %v334_v1, %v333_v7 }
  0xb9   :  { %v1019_v45 = vmax.f32 %v248_v43, 0.0  ;;  %v356_v5 = vadd.f32 %v355_v62, %v354_v0 }
  0xba   :  { %v337_v19 = vadd.f32 %v336_v6, %v335_v12  ;;  %v223_v6 = vadd.f32 %v222_v63, %v1001_v55  ;;  %v169_v12 = vld [vmem:[%s1435_s2 + $0x18] sm:$0xff] }
  0xbb   :  { %v127_v51 = vpop.xlane.xlu2 %126  ;;  %v1032_v52 = vmul.f32 %v1019_v45, %v1027_v49  ;;  %v1046_v60 = vmul.f32 %v1019_v45, %v1042_v59  ;;  %v358_v20 = vadd.f32 %v357_v9, %v356_v5 }
  0xbc   :  { %v148_v54 = vpop.xlane.xlu1 %147  ;;  %v320_v17 = vmul.f32 %v976_v21, %v127_v51 }
  0xbd   :  { %v124_v56 = vpop.xlane.xlu0 %123  ;;  %v327_v2 = vmul.f32 %v968_v16, %v148_v54 }
  0xbe   :  { %v319_v3 = vmul.f32 %v968_v16, %v124_v56  ;;  %v340_v26 = vsel %vm206_vm0, %v320_v17, 0.0 }
  0xbf   :  { %v359_v15 = vsel %vm206_vm0, %v327_v2, 0.0  ;;  %v1092_v2 = vld [vmem:[%s1435_s2 + $0x38] sm:$0xff] }
  0xc0   :  { %v338_v8 = vsel %vm206_vm0, %v319_v3, 0.0  ;;  %v360_v24 = vadd.f32 %v359_v15, %v358_v20  ;;  %v1097_v3 = vld [vmem:[%s1435_s2 + $0x20] sm:$0xff]  ;;  %v1118_v20 = vld [vmem:[%s1435_s2 + $0x30] sm:$0xff] }
  0xc1   :  { %v339_v25 = vadd.f32 %v338_v8, %v337_v19  ;;  %v265_v63 = vmul.f32 %v1019_v45, %v1118_v20 }
  0xc3   :  { %v154_v11 = vpop.xlane.xlu2 %153  ;;  %v341_v30 = vadd.f32 %v340_v26, %v339_v25 }
  0xc4   :  { %v130_v13 = vpop.xlane.xlu1 %129  ;;  %v329_v23 = vmul.f32 %v992_v33, %v154_v11 }
  0xc5   :  { %v151_v14 = vpop.xlane.xlu0 %150  ;;  %v321_v16 = vmul.f32 %v992_v33, %v130_v13 }
  0xc6   :  { %v328_v18 = vmul.f32 %v976_v21, %v151_v14  ;;  %v363_v29 = vsel %vm206_vm0, %v329_v23, 0.0  ;;  %v224_v14 = vrot.slane %v223_v6, 2 }
  0xc7   :  { %v342_v28 = vsel %vm206_vm0, %v321_v16, 0.0 }
  0xc8   :  { %v361_v22 = vsel %vm206_vm0, %v328_v18, 0.0  ;;  %v343_v36 = vadd.f32 %v342_v28, %v341_v30  ;;  %v225_v55 = vadd.f32 %v224_v14, %v223_v6 }
  0xc9   :  { %v362_v27 = vadd.f32 %v361_v22, %v360_v24 }
  0xca   :  { %v226_v22 = vrot.slane %v225_v55, 1 }
  0xcb   :  { %v364_v37 = vadd.f32 %v363_v29, %v362_v27 }
  0xcc   :  { %v157_v32 = vpop.xlane.xlu1 %156  ;;  %v227_v26 = vadd.f32 %v226_v22, %v225_v55 }
  0xcd   :  { %v133_v21 = vpop.xlane.xlu0 %132  ;;  %v330_v34 = vmul.f32 %v987_v31, %v157_v32 }
  0xce   :  { %v322_v35 = vmul.f32 %v987_v31, %v133_v21  ;;  %v249_v30 = vmax.f32 %v227_v26, 0.0 }
  0xcf   :  { %v365_v33 = vsel %vm206_vm0, %v330_v34, 0.0 }
  0xd0   :  { %v344_v38 = vsel %vm206_vm0, %v322_v35, 0.0  ;;  %v366_v39 = vadd.f32 %v365_v33, %v364_v37  ;;  %v251_v35 = vmul.f32 %v249_v30, %v1078_v4 }
  0xd1   :  { %v345_v40 = vadd.f32 %v344_v38, %v343_v36  ;;  %v253_v36 = vmul.f32 %v249_v30, %v1027_v49 }
  0xd2   :  { %v367_v41 = vrot.slane %v366_v39, 4  ;;  %v267_v33 = vsel %vm206_vm0, %v251_v35, 0.0 }
  0xd3   :  { %v346_v42 = vrot.slane %v345_v40, 4  ;;  %v273_v38 = vsel %vm206_vm0, %v253_v36, 0.0 }
  0xd4   :  { %v368_v43 = vadd.f32 %v367_v41, %v366_v39  ;;  %v256_v41 = vmul.f32 %v249_v30, %v1042_v59 }
  0xd5   :  { %v347_v44 = vadd.f32 %v346_v42, %v345_v40  ;;  %v254_v40 = vmul.f32 %v249_v30, %v169_v12  ;;  %v252_v42 = vmul.f32 %v249_v30, %v1073_v10 }
  0xd6   :  { %v369_v46 = vrot.slane %v368_v43, 2 }
  0xd7   :  { %v348_v47 = vrot.slane %v347_v44, 2 }
  0xd8   :  { %v370_v48 = vadd.f32 %v369_v46, %v368_v43  ;;  %v276_v43 = vsel %vm206_vm0, %v254_v40, 0.0  ;;  %v257_v46 = vmul.f32 %v249_v30, %v1118_v20 }
  0xd9   :  { %v349_v50 = vadd.f32 %v348_v47, %v347_v44  ;;  %v270_v44 = vsel %vm206_vm0, %v252_v42, 0.0  ;;  %v259_v47 = vmul.f32 %v1019_v45, %v1078_v4 }
  0xda   :  { %v371_v51 = vrot.slane %v370_v48, 1 }
  0xdb   :  { %v350_v53 = vrot.slane %v349_v50, 1 }
  0xdc   :  { %v372_v31 = vadd.f32 %v371_v51, %v370_v48  ;;  %v255_v48 = vmul.f32 %v249_v30, %v1097_v3  ;;  %v291_v51 = vsel %vm206_vm0, %v259_v47, 0.0 }
  0xdd   :  { %v351_v54 = vadd.f32 %v350_v53, %v349_v50  ;;  %v285_v50 = vsel %vm206_vm0, %v257_v46, 0.0 }
  0xde   :  { %v1083_v62 = vmax.f32 %v372_v31, 0.0  ;;  %v279_v53 = vsel %vm206_vm0, %v255_v48, 0.0  ;;  %v262_v31 = vmul.f32 %v1019_v45, %v169_v12 }
  0xdf   :  { %v373_v56 = vmax.f32 %v351_v54, 0.0  ;;  %v260_v54 = vmul.f32 %v1019_v45, %v1073_v10 }
  0xe0   :  { %v1101_v5 = vmul.f32 %v1083_v62, %v1092_v2  ;;  %v383_v18 = vmul.f32 %v1083_v62, %v1078_v4  ;;  %v386_v27 = vmul.f32 %v1083_v62, %v169_v12  ;;  %v385_v28 = vmul.f32 %v1083_v62, %v1027_v49 }
  0xe1   :  { %v377_v57 = vmul.f32 %v373_v56, %v1027_v49  ;;  %v376_v58 = vmul.f32 %v373_v56, %v1073_v10  ;;  %v375_v61 = vmul.f32 %v373_v56, %v1078_v4  ;;  %v380_v9 = vmul.f32 %v373_v56, %v1042_v59 }
  0xe2   :  { %v379_v11 = vmul.f32 %v373_v56, %v1097_v3  ;;  %v378_v13 = vmul.f32 %v373_v56, %v169_v12  ;;  %v382_v19 = vmul.f32 %v373_v56, %v1092_v2  ;;  %v381_v16 = vmul.f32 %v373_v56, %v1118_v20 }
  0xe3   :  { %v397_v7 = vsel %vm206_vm0, %v377_v57, 0.0  ;;  %v394_v0 = vsel %vm206_vm0, %v376_v58, 0.0  ;;  %v391_v1 = vsel %vm206_vm0, %v375_v61, 0.0  ;;  %v406_v15 = vsel %vm206_vm0, %v380_v9, 0.0 }
  0xe4   :  { %398 = vadd.xlane.f32.xlu2 %v397_v7  ;;  %395 = vadd.xlane.f32.xlu1 %v394_v0  ;;  %v403_v8 = vsel %vm206_vm0, %v379_v11, 0.0  ;;  %v400_v17 = vsel %vm206_vm0, %v378_v13, 0.0  ;;  %v415_v23 = vsel %vm206_vm0, %v383_v18, 0.0  ;;  %v412_v24 = vsel %vm206_vm0, %v382_v19, 0.0 }
  0xe5   :  { %392 = vadd.xlane.f32.xlu0 %v391_v1  ;;  %v409_v25 = vsel %vm206_vm0, %v381_v16, 0.0  ;;  %v384_v29 = vmul.f32 %v1083_v62, %v1073_v10  ;;  %v424_v32 = vsel %vm206_vm0, %v386_v27, 0.0  ;;  %v421_v21 = vsel %vm206_vm0, %v385_v28, 0.0 }
  0xe6   :  { %v387_v37 = vmul.f32 %v1083_v62, %v1097_v3  ;;  %v282_v49 = vsel %vm206_vm0, %v256_v41, 0.0  ;;  %v258_v56 = vmul.f32 %v249_v30, %v1092_v2  ;;  %v294_v4 = vsel %vm206_vm0, %v260_v54, 0.0 }
  0xe7   :  { %v418_v34 = vsel %vm206_vm0, %v384_v29, 0.0  ;;  %v300_v57 = vsel %vm206_vm0, %v262_v31, 0.0  ;;  %v263_v61 = vmul.f32 %v1019_v45, %v1097_v3  ;;  %v309_v7 = vsel %vm206_vm0, %v265_v63, 0.0 }
  0xe8   :  { %v427_v39 = vsel %vm206_vm0, %v387_v37, 0.0  ;;  %v288_v58 = vsel %vm206_vm0, %v258_v56, 0.0  ;;  %v297_v0 = vsel %vm206_vm0, %v1032_v52, 0.0  ;;  %v266_v1 = vmul.f32 %v1019_v45, %v1092_v2 }
  0xe9   :  { %v303_v10 = vsel %vm206_vm0, %v263_v61, 0.0  ;;  %v388_v6 = vmul.f32 %v1083_v62, %v1042_v59  ;;  %v306_v11 = vsel %vm206_vm0, %v1046_v60, 0.0  ;;  %v389_v52 = vmul.f32 %v1083_v62, %v1118_v20 }
  0xea   :  { %v312_v3 = vsel %vm206_vm0, %v266_v1, 0.0  ;;  %v436_v45 = vsel %vm206_vm0, %v1101_v5, 0.0 }
  0xeb   :  { %v430_v9 = vsel %vm206_vm0, %v388_v6, 0.0  ;;  %v433_v12 = vsel %vm206_vm0, %v389_v52, 0.0 }
  0xec   :  { %407 = vadd.xlane.f32.xlu2 %v406_v15  ;;  %404 = vadd.xlane.f32.xlu1 %v403_v8 }
  0xed   :  { %401 = vadd.xlane.f32.xlu0 %v400_v17 }
  0xf4   :  { %416 = vadd.xlane.f32.xlu2 %v415_v23  ;;  %413 = vadd.xlane.f32.xlu1 %v412_v24 }
  0xf5   :  { %410 = vadd.xlane.f32.xlu0 %v409_v25 }
  0xfc   :  { %425 = vadd.xlane.f32.xlu2 %v424_v32  ;;  %422 = vadd.xlane.f32.xlu1 %v421_v21 }
  0xfd   :  { %419 = vadd.xlane.f32.xlu0 %v418_v34 }
 0x104   :  { %268 = vadd.xlane.f32.xlu2 %v267_v33  ;;  %274 = vadd.xlane.f32.xlu1 %v273_v38 }
 0x105   :  { %428 = vadd.xlane.f32.xlu0 %v427_v39 }
 0x10c   :  { %277 = vadd.xlane.f32.xlu2 %v276_v43  ;;  %283 = vadd.xlane.f32.xlu1 %v282_v49 }
 0x10d   :  { %271 = vadd.xlane.f32.xlu0 %v270_v44 }
 0x114   :  { %286 = vadd.xlane.f32.xlu2 %v285_v50  ;;  %292 = vadd.xlane.f32.xlu1 %v291_v51 }
 0x115   :  { %280 = vadd.xlane.f32.xlu0 %v279_v53 }
 0x11c   :  { %295 = vadd.xlane.f32.xlu2 %v294_v4  ;;  %301 = vadd.xlane.f32.xlu1 %v300_v57 }
 0x11d   :  { %289 = vadd.xlane.f32.xlu0 %v288_v58 }
 0x124   :  { %304 = vadd.xlane.f32.xlu2 %v303_v10  ;;  %310 = vadd.xlane.f32.xlu1 %v309_v7 }
 0x125   :  { %298 = vadd.xlane.f32.xlu0 %v297_v0 }
 0x12c   :  { %313 = vadd.xlane.f32.xlu2 %v312_v3  ;;  %431 = vadd.xlane.f32.xlu1 %v430_v9 }
 0x12d   :  { %307 = vadd.xlane.f32.xlu0 %v306_v11 }
 0x134   :  { %434 = vadd.xlane.f32.xlu2 %v433_v12 }
 0x135   :  { %437 = vadd.xlane.f32.xlu0 %v436_v45 }
 0x157   :  { %v399_v59 = vpop.xlane.xlu2 %398  ;;  %v396_v2 = vpop.xlane.xlu1 %395 }
 0x158   :  { %v393_v13 = vpop.xlane.xlu0 %392 }
 0x15f   :  { %v408_v14 = vpop.xlane.xlu2 %407  ;;  %v405_v15 = vpop.xlane.xlu1 %404 }
 0x160   :  { %v402_v8 = vpop.xlane.xlu0 %401 }
 0x167   :  { %v417_v17 = vpop.xlane.xlu2 %416  ;;  %v1179_v55 = vpop.xlane.xlu1 %413 }
 0x168   :  { %v411_v60 = vpop.xlane.xlu0 %410 }
 0x16f   :  { %v1181_v18 = vpop.xlane.xlu2 %425  ;;  %v1183_v62 = vpop.xlane.xlu1 %422 }
 0x170   :  { %v1185_v19 = vpop.xlane.xlu0 %419 }
 0x177   :  { %v269_v20 = vpop.xlane.xlu2 %268  ;;  %v275_v16 = vpop.xlane.xlu1 %274 }
 0x178   :  { %v439_v5 = vadd.f32 %v393_v13, %v269_v20  ;;  %v441_v22 = vadd.f32 %v399_v59, %v275_v16  ;;  %v1187_v23 = vpop.xlane.xlu0 %428 }
 0x17a   :  { %v455_v24 = vsub.f32 0.0, %v439_v5  ;;  %v457_v25 = vsub.f32 0.0, %v441_v22 }
 0x17c   :  { %v471_v26 = vmul.f32 1.442695, %v455_v24  ;;  %v475_v27 = vmul.f32 1.442695, %v457_v25 }
 0x17e   :  { %784 = vpow2.f32 %v471_v26 }
 0x17f   :  { %786 = vpow2.f32 %v475_v27  ;;  %v278_v28 = vpop.xlane.xlu2 %277  ;;  %v284_v29 = vpop.xlane.xlu1 %283 }
 0x180   :  { %v442_v30 = vadd.f32 %v402_v8, %v278_v28  ;;  %v444_v32 = vadd.f32 %v408_v14, %v284_v29  ;;  %v272_v21 = vpop.xlane.xlu0 %271 }
 0x181   :  { %v440_v34 = vadd.f32 %v396_v2, %v272_v21 }
 0x182   :  { %v458_v35 = vsub.f32 0.0, %v442_v30  ;;  %v460_v36 = vsub.f32 0.0, %v444_v32 }
 0x183   :  { %v456_v37 = vsub.f32 0.0, %v440_v34 }
 0x184   :  { %v785_v33 = vpop.eup %784  ;;  %v477_v38 = vmul.f32 1.442695, %v458_v35  ;;  %v481_v41 = vmul.f32 1.442695, %v460_v36 }
 0x185   :  { %v787_v39 = vpop.eup %786  ;;  %v503_v40 = vadd.f32 1.0, %v785_v33  ;;  %v473_v43 = vmul.f32 1.442695, %v456_v37 }
 0x186   :  { %v505_v42 = vadd.f32 1.0, %v787_v39  ;;  %788 = vpow2.f32 %v477_v38 }
 0x187   :  { %790 = vrcp.f32 %v503_v40  ;;  %v287_v49 = vpop.xlane.xlu2 %286  ;;  %v293_v44 = vpop.xlane.xlu1 %292  ;;  %v528_v31 = vand.u32 2147483647, %v503_v40  ;;  %vm524_vm2 = vweird.f32 %v503_v40  ;;  %v530_v61 = vand.u32 2147483648, %v503_v40 }
 0x188   :  { %792 = vrcp.f32 %v505_v42  ;;  %v281_v46 = vpop.xlane.xlu0 %280  ;;  %v445_v47 = vadd.f32 %v411_v60, %v287_v49  ;;  %v447_v50 = vadd.f32 %v417_v17, %v293_v44  ;;  %vm554_vm3 = vweird.f32 %v505_v42 }
 0x189   :  { %794 = vpow2.f32 %v481_v41  ;;  %v443_v53 = vadd.f32 %v405_v15, %v281_v46  ;;  %v558_v7 = vand.u32 2147483647, %v505_v42  ;;  %v560_v11 = vand.u32 2147483648, %v505_v42 }
 0x18a   :  { %796 = vpow2.f32 %v473_v43  ;;  %v461_v48 = vsub.f32 0.0, %v445_v47  ;;  %v463_v0 = vsub.f32 0.0, %v447_v50  ;;  %vm1196_vm4 = vcmp.eq.f32.partialorder %v528_v31, 8.507059e+37 }
 0x18b   :  { %v459_v12 = vsub.f32 0.0, %v443_v53  ;;  %v531_v8 = vor.u32 1.1754944e-38, %v530_v61  ;;  %vm1204_vm7 = vcmp.eq.f32.partialorder %v558_v7, 8.507059e+37  ;;  %v561_v25 = vor.u32 1.1754944e-38, %v560_v11 }
 0x18c   :  { %v789_v51 = vpop.eup %788  ;;  %v483_v4 = vmul.f32 1.442695, %v461_v48  ;;  %v487_v60 = vmul.f32 1.442695, %v463_v0 }
 0x18d   :  { %v791_v54 = vpop.eup %790  ;;  %v1189_v56 = vadd.f32 1.0, %v789_v51  ;;  %v479_v5 = vmul.f32 1.442695, %v459_v12 }
 0x18e   :  { %v793_v57 = vpop.eup %792  ;;  %v520_v58 = vmul.f32 %v791_v54, %v503_v40  ;;  %vm525_vm5 = vweird.f32 %v791_v54 }
 0x18f   :  { %v795_v63 = vpop.eup %794  ;;  %v550_v10 = vmul.f32 %v793_v57, %v505_v42  ;;  %798 = vrcp.f32 %v1189_v56  ;;  %v296_v1 = vpop.xlane.xlu2 %295  ;;  %v573_v15 = vand.u32 2147483647, %v1189_v56  ;;  %vm555_vm6 = vweird.f32 %v793_v57  ;;  %vm526_vm8 = vmor %vm524_vm2, %vm525_vm5 }
 0x190   :  { %v302_v6 = vpop.xlane.xlu1 %301  ;;  %v797_v3 = vpop.eup %796  ;;  %v521_v9 = vsub.f32 1.0, %v520_v58  ;;  %v1192_v52 = vadd.f32 1.0, %v795_v63  ;;  %800 = vpow2.f32 %v483_v4  ;;  %vm569_vm9 = vweird.f32 %v1189_v56  ;;  %vm556_vm10 = vmor %vm554_vm3, %vm555_vm6 }
 0x191   :  { %v1194_v45 = vpop.xlane.xlu0 %289  ;;  %v551_v2 = vsub.f32 1.0, %v550_v10  ;;  %v1200_v13 = vadd.f32 1.0, %v797_v3  ;;  %v575_v26 = vand.u32 2147483648, %v1189_v56  ;;  %vm1214_vm11 = vcmp.eq.f32.partialorder %v573_v15, 8.507059e+37 }
 0x192   :  { %v522_v14 = vmul.f32 %v791_v54, %v521_v9  ;;  %802 = vrcp.f32 %v1192_v52  ;;  %v603_v30 = vand.u32 2147483647, %v1192_v52  ;;  %v605_v35 = vand.u32 2147483648, %v1192_v52 }
 0x193   :  { %v552_v17 = vmul.f32 %v793_v57, %v551_v2  ;;  %804 = vrcp.f32 %v1200_v13  ;;  %v576_v40 = vor.u32 1.1754944e-38, %v575_v26  ;;  %v448_v42 = vadd.f32 %v1185_v19, %v296_v1 }
 0x194   :  { %v523_v20 = vadd.f32 %v791_v54, %v522_v14  ;;  %806 = vpow2.f32 %v487_v60  ;;  %v450_v43 = vadd.f32 %v1181_v18, %v302_v6  ;;  %vm599_vm13 = vweird.f32 %v1192_v52 }
 0x195   :  { %v799_v22 = vpop.eup %798  ;;  %v553_v24 = vadd.f32 %v793_v57, %v552_v17  ;;  %808 = vpow2.f32 %v479_v5  ;;  %vm539_vm14 = vweird.f32 %v1200_v13  ;;  %v543_v19 = vand.u32 2147483647, %v1200_v13 }
 0x196   :  { %v527_v27 = vsel %vm526_vm8, %v791_v54, %v523_v20  ;;  %v565_v28 = vmul.f32 %v799_v22, %v1189_v56  ;;  %v801_v32 = vpop.eup %800  ;;  %vm570_vm12 = vweird.f32 %v799_v22  ;;  %vm1248_vm15 = vcmp.eq.f32.partialorder %v603_v30, 8.507059e+37 }
 0x197   :  { %v532_v21 = vsel %vm1196_vm4, %v531_v8, %v527_v27  ;;  %v557_v34 = vsel %vm556_vm10, %v793_v57, %v553_v24  ;;  %v1222_v36 = vpop.xlane.xlu2 %304  ;;  %v1230_v39 = vadd.f32 1.0, %v801_v32  ;;  %v606_v53 = vor.u32 1.1754944e-38, %v605_v35  ;;  %vm571_vm0 = vmor %vm569_vm9, %vm570_vm12 }
 0x198   :  { %v803_v37 = vpop.eup %802  ;;  %760 = vst.msk [vmem:[%s1436_s3] sm:$0xff] %vm759_vm1, %v532_v21  ;;  %v562_v33 = vsel %vm1204_vm7, %v561_v25, %v557_v34  ;;  %v566_v38 = vsub.f32 1.0, %v565_v28  ;;  %v1239_v49 = vpop.xlane.xlu1 %310  ;;  %v464_v54 = vsub.f32 0.0, %v448_v42  ;;  %v466_v58 = vsub.f32 0.0, %v450_v43 }
 0x199   :  { %762 = vst.msk [vmem:[%s1436_s3 + $0x10] sm:$0xff] %vm759_vm1, %v562_v33  ;;  %v595_v41 = vmul.f32 %v803_v37, %v1192_v52  ;;  %v1241_v44 = vpop.xlane.xlu0 %298  ;;  %v805_v46 = vpop.eup %804  ;;  %810 = vrcp.f32 %v1230_v39  ;;  %vm600_vm2 = vweird.f32 %v803_v37  ;;  %v545_v10 = vand.u32 2147483648, %v1200_v13 }
 0x19a   :  { %v567_v47 = vmul.f32 %v799_v22, %v566_v38  ;;  %v535_v50 = vmul.f32 %v805_v46, %v1200_v13  ;;  %v807_v31 = vpop.eup %806  ;;  %vm540_vm3 = vweird.f32 %v805_v46  ;;  %vm601_vm4 = vmor %vm599_vm13, %vm600_vm2  ;;  %v618_v11 = vand.u32 2147483647, %v1230_v39 }
 0x19b   :  { %v596_v48 = vsub.f32 1.0, %v595_v41  ;;  %v809_v61 = vpop.eup %808  ;;  %v1255_v7 = vadd.f32 1.0, %v807_v31  ;;  %v489_v12 = vmul.f32 1.442695, %v464_v54  ;;  %v446_v59 = vadd.f32 %v1179_v55, %v1194_v45  ;;  %vm541_vm5 = vmor %vm539_vm14, %vm540_vm3 }
 0x19c   :  { %v568_v51 = vadd.f32 %v799_v22, %v567_v47  ;;  %v536_v57 = vsub.f32 1.0, %v535_v50  ;;  %v1259_v3 = vadd.f32 1.0, %v809_v61  ;;  %v493_v8 = vmul.f32 1.442695, %v466_v58 }
 0x19d   :  { %v597_v4 = vmul.f32 %v803_v37, %v596_v48  ;;  %812 = vrcp.f32 %v1255_v7  ;;  %v546_v52 = vor.u32 1.1754944e-38, %v545_v10  ;;  %v620_v60 = vand.u32 2147483648, %v1230_v39 }
 0x19e   :  { %v572_v63 = vsel %vm571_vm0, %v799_v22, %v568_v51  ;;  %v537_v6 = vmul.f32 %v805_v46, %v536_v57  ;;  %814 = vrcp.f32 %v1259_v3  ;;  %vm544_vm6 = vcmp.eq.f32.partialorder %v543_v19, 8.507059e+37 }
 0x19f   :  { %v577_v0 = vsel %vm1214_vm11, %v576_v40, %v572_v63  ;;  %v598_v1 = vadd.f32 %v803_v37, %v597_v4  ;;  %v1261_v56 = vpop.xlane.xlu2 %313  ;;  %v811_v9 = vpop.eup %810  ;;  %vm614_vm7 = vweird.f32 %v1230_v39  ;;  %vm1287_vm8 = vcmp.eq.f32.partialorder %v618_v11, 8.507059e+37 }
 0x1a0   :  { %763 = vst.msk [vmem:[%s1436_s3 + $0x18] sm:$0xff] %vm759_vm1, %v577_v0  ;;  %v538_v14 = vadd.f32 %v805_v46, %v537_v6  ;;  %v610_v15 = vmul.f32 %v811_v9, %v1230_v39  ;;  %v432_v20 = vpop.xlane.xlu1 %431  ;;  %816 = vpow2.f32 %v489_v12  ;;  %v462_v22 = vsub.f32 0.0, %v446_v59 }
 0x1a1   :  { %v602_v2 = vsel %vm601_vm4, %v803_v37, %v598_v1  ;;  %v308_v16 = vpop.xlane.xlu0 %307  ;;  %vm615_vm9 = vweird.f32 %v811_v9  ;;  %818 = vpow2.f32 %v493_v8  ;;  %v451_v25 = vadd.f32 %v1187_v23, %v1222_v36 }
 0x1a2   :  { %v607_v17 = vsel %vm1248_vm15, %v606_v53, %v602_v2  ;;  %v542_v55 = vsel %vm541_vm5, %v805_v46, %v538_v14  ;;  %v611_v45 = vsub.f32 1.0, %v610_v15  ;;  %v621_v27 = vor.u32 1.1754944e-38, %v620_v60  ;;  %vm616_vm11 = vmor %vm614_vm7, %vm615_vm9 }
 0x1a3   :  { %765 = vst.msk [vmem:[%s1436_s3 + $0x28] sm:$0xff] %vm759_vm1, %v607_v17  ;;  %v547_v5 = vsel %vm544_vm6, %v546_v52, %v542_v55  ;;  %v813_v26 = vpop.eup %812  ;;  %v485_v28 = vmul.f32 1.442695, %v462_v22  ;;  %v449_v29 = vadd.f32 %v1183_v62, %v1241_v44  ;;  %v452_v30 = vadd.f32 %v432_v20, %v308_v16 }
 0x1a4   :  { %761 = vst.msk [vmem:[%s1436_s3 + $0x8] sm:$0xff] %vm759_vm1, %v547_v5  ;;  %v612_v24 = vmul.f32 %v811_v9, %v611_v45  ;;  %v640_v21 = vmul.f32 %v813_v26, %v1255_v7  ;;  %vm644_vm10 = vweird.f32 %v1255_v7  ;;  %v467_v34 = vsub.f32 0.0, %v451_v25  ;;  %v815_v35 = vpop.eup %814 }
 0x1a5   :  { %v648_v37 = vand.u32 2147483647, %v1255_v7  ;;  %v650_v23 = vand.u32 2147483648, %v1255_v7  ;;  %v588_v36 = vand.u32 2147483647, %v1259_v3  ;;  %820 = vpow2.f32 %v485_v28 }
 0x1a6   :  { %v613_v32 = vadd.f32 %v811_v9, %v612_v24  ;;  %v641_v38 = vsub.f32 1.0, %v640_v21  ;;  %v580_v40 = vmul.f32 %v815_v35, %v1259_v3  ;;  %v465_v41 = vsub.f32 0.0, %v449_v29  ;;  %v817_v42 = vpop.eup %816 }
 0x1a7   :  { %v435_v33 = vpop.xlane.xlu2 %434  ;;  %vm645_vm12 = vweird.f32 %v813_v26  ;;  %v495_v39 = vmul.f32 1.442695, %v467_v34  ;;  %v468_v44 = vsub.f32 0.0, %v452_v30  ;;  %v819_v46 = vpop.eup %818  ;;  %v1313_v50 = vadd.f32 1.0, %v817_v42 }
 0x1a8   :  { %v617_v62 = vsel %vm616_vm11, %v811_v9, %v613_v32  ;;  %v642_v47 = vmul.f32 %v813_v26, %v641_v38  ;;  %v581_v48 = vsub.f32 1.0, %v580_v40  ;;  %v453_v19 = vadd.f32 %v435_v33, %v1239_v49  ;;  %vm646_vm14 = vmor %vm644_vm10, %vm645_vm12 }
 0x1a9   :  { %v622_v43 = vsel %vm1287_vm8, %v621_v27, %v617_v62  ;;  %vm585_vm13 = vweird.f32 %v815_v35  ;;  %v590_v51 = vand.u32 2147483648, %v1259_v3  ;;  %v1317_v18 = vadd.f32 1.0, %v819_v46  ;;  %v438_v4 = vpop.xlane.xlu0 %437 }
 0x1aa   :  { %766 = vst.msk [vmem:[%s1436_s3 + $0x30] sm:$0xff] %vm759_vm1, %v622_v43  ;;  %822 = vpow2.f32 %v495_v39  ;;  %v643_v53 = vadd.f32 %v813_v26, %v642_v47  ;;  %v582_v54 = vmul.f32 %v815_v35, %v581_v48  ;;  %v491_v31 = vmul.f32 1.442695, %v465_v41 }
 0x1ab   :  { %824 = vrcp.f32 %v1313_v50  ;;  %v821_v57 = vpop.eup %820  ;;  %vm649_vm15 = vcmp.eq.f32.partialorder %v648_v37, 8.507059e+37  ;;  %v651_v58 = vor.u32 1.1754944e-38, %v650_v23  ;;  %vm584_vm0 = vweird.f32 %v1259_v3 }
 0x1ac   :  { %826 = vrcp.f32 %v1317_v18  ;;  %v647_v49 = vsel %vm646_vm14, %v813_v26, %v643_v53  ;;  %v583_v61 = vadd.f32 %v815_v35, %v582_v54  ;;  %v497_v63 = vmul.f32 1.442695, %v468_v44  ;;  %vm586_vm2 = vmor %vm584_vm0, %vm585_vm13 }
 0x1ad   :  { %v469_v10 = vsub.f32 0.0, %v453_v19  ;;  %v652_v0 = vsel %vm649_vm15, %v651_v58, %v647_v49  ;;  %v591_v1 = vor.u32 1.1754944e-38, %v590_v51  ;;  %v1326_v6 = vadd.f32 1.0, %v821_v57 }
 0x1ae   :  { %v454_v9 = vadd.f32 %v438_v4, %v1261_v56  ;;  %768 = vst.msk [vmem:[%s1436_s3 + $0x40] sm:$0xff] %vm759_vm1, %v652_v0  ;;  %v587_v7 = vsel %vm586_vm2, %v815_v35, %v583_v61  ;;  %vm589_vm3 = vcmp.eq.f32.partialorder %v588_v36, 8.507059e+37  ;;  %828 = vpow2.f32 %v491_v31 }
 0x1af   :  { %v592_v11 = vsel %vm589_vm3, %v591_v1, %v587_v7  ;;  %830 = vrcp.f32 %v1326_v6  ;;  %v499_v56 = vmul.f32 1.442695, %v469_v10  ;;  %v663_v15 = vand.u32 2147483647, %v1313_v50 }
 0x1b0   :  { %v823_v3 = vpop.eup %822  ;;  %764 = vst.msk [vmem:[%s1436_s3 + $0x20] sm:$0xff] %vm759_vm1, %v592_v11  ;;  %832 = vpow2.f32 %v497_v63  ;;  %v470_v8 = vsub.f32 0.0, %v454_v9  ;;  %vm659_vm4 = vweird.f32 %v1313_v50  ;;  %v665_v60 = vand.u32 2147483648, %v1313_v50 }
 0x1b1   :  { %v825_v12 = vpop.eup %824  ;;  %v1338_v59 = vadd.f32 1.0, %v823_v3  ;;  %vm689_vm5 = vweird.f32 %v1317_v18  ;;  %v693_v55 = vand.u32 2147483647, %v1317_v18  ;;  %v695_v16 = vand.u32 2147483648, %v1317_v18 }
 0x1b2   :  { %v827_v2 = vpop.eup %826  ;;  %v655_v14 = vmul.f32 %v825_v12, %v1313_v50  ;;  %v501_v5 = vmul.f32 1.442695, %v470_v8  ;;  %vm660_vm6 = vweird.f32 %v825_v12  ;;  %vm1349_vm7 = vcmp.eq.f32.partialorder %v663_v15, 8.507059e+37 }
 0x1b3   :  { %v685_v17 = vmul.f32 %v827_v2, %v1317_v18  ;;  %834 = vrcp.f32 %v1338_v59  ;;  %vm690_vm8 = vweird.f32 %v827_v2  ;;  %v666_v30 = vor.u32 1.1754944e-38, %v665_v60  ;;  %vm661_vm10 = vmor %vm659_vm4, %vm660_vm6 }
 0x1b4   :  { %v656_v52 = vsub.f32 1.0, %v655_v14  ;;  %v829_v45 = vpop.eup %828  ;;  %836 = vpow2.f32 %v499_v56  ;;  %vm1356_vm9 = vcmp.eq.f32.partialorder %v693_v55, 8.507059e+37  ;;  %v696_v35 = vor.u32 1.1754944e-38, %v695_v16  ;;  %vm691_vm11 = vmor %vm689_vm5, %vm690_vm8 }
 0x1b5   :  { %v686_v20 = vsub.f32 1.0, %v685_v17  ;;  %v831_v13 = vpop.eup %830  ;;  %v1353_v25 = vadd.f32 1.0, %v829_v45  ;;  %838 = vpow2.f32 %v501_v5  ;;  %v633_v33 = vand.u32 2147483647, %v1326_v6 }
 0x1b6   :  { %v657_v22 = vmul.f32 %v825_v12, %v656_v52  ;;  %v833_v26 = vpop.eup %832  ;;  %v625_v28 = vmul.f32 %v831_v13, %v1326_v6  ;;  %v635_v62 = vand.u32 2147483648, %v1326_v6  ;;  %vm630_vm12 = vweird.f32 %v831_v13 }
 0x1b7   :  { %v687_v27 = vmul.f32 %v827_v2, %v686_v20  ;;  %840 = vrcp.f32 %v1353_v25  ;;  %v1363_v23 = vadd.f32 1.0, %v833_v26  ;;  %vm629_vm13 = vweird.f32 %v1326_v6 }
 0x1b8   :  { %v658_v29 = vadd.f32 %v825_v12, %v657_v22  ;;  %v626_v37 = vsub.f32 1.0, %v625_v28  ;;  %v708_v48 = vand.u32 2147483647, %v1338_v59  ;;  %v710_v50 = vand.u32 2147483648, %v1338_v59  ;;  %vm631_vm14 = vmor %vm629_vm13, %vm630_vm12 }
 0x1b9   :  { %v835_v21 = vpop.eup %834  ;;  %v688_v34 = vadd.f32 %v827_v2, %v687_v27  ;;  %842 = vrcp.f32 %v1363_v23  ;;  %v636_v18 = vor.u32 1.1754944e-38, %v635_v62  ;;  %vm634_vm0 = vcmp.eq.f32.partialorder %v633_v33, 8.507059e+37 }
 0x1ba   :  { %v662_v36 = vsel %vm661_vm10, %v825_v12, %v658_v29  ;;  %v700_v38 = vmul.f32 %v835_v21, %v1338_v59  ;;  %v837_v40 = vpop.eup %836  ;;  %v627_v43 = vmul.f32 %v831_v13, %v626_v37  ;;  %vm705_vm15 = vweird.f32 %v835_v21 }
 0x1bb   :  { %v667_v41 = vsel %vm1349_vm7, %v666_v30, %v662_v36  ;;  %v692_v42 = vsel %vm691_vm11, %v827_v2, %v688_v34  ;;  %v839_v46 = vpop.eup %838  ;;  %v1386_v19 = vadd.f32 1.0, %v837_v40  ;;  %vm704_vm2 = vweird.f32 %v1338_v59 }
 0x1bc   :  { %769 = vst.msk [vmem:[%s1436_s3 + $0x48] sm:$0xff] %vm759_vm1, %v667_v41  ;;  %v697_v39 = vsel %vm1356_vm9, %v696_v35, %v692_v42  ;;  %v701_v44 = vsub.f32 1.0, %v700_v38  ;;  %v628_v47 = vadd.f32 %v831_v13, %v627_v43  ;;  %v1388_v54 = vadd.f32 1.0, %v839_v46  ;;  %vm706_vm3 = vmor %vm704_vm2, %vm705_vm15 }
 0x1bd   :  { %771 = vst.msk [vmem:[%s1436_s3 + $0x58] sm:$0xff] %vm759_vm1, %v697_v39  ;;  %v841_v51 = vpop.eup %840  ;;  %844 = vrcp.f32 %v1386_v19  ;;  %vm709_vm4 = vcmp.eq.f32.partialorder %v708_v48, 8.507059e+37  ;;  %v711_v49 = vor.u32 1.1754944e-38, %v710_v50  ;;  %v678_v0 = vand.u32 2147483647, %v1353_v25 }
 0x1be   :  { %v702_v53 = vmul.f32 %v835_v21, %v701_v44  ;;  %v632_v31 = vsel %vm631_vm14, %v831_v13, %v628_v47  ;;  %v670_v4 = vmul.f32 %v841_v51, %v1353_v25  ;;  %v680_v1 = vand.u32 2147483648, %v1353_v25 }
 0x1bf   :  { %v637_v57 = vsel %vm634_vm0, %v636_v18, %v632_v31  ;;  %v843_v63 = vpop.eup %842  ;;  %846 = vrcp.f32 %v1388_v54  ;;  %vm675_vm5 = vweird.f32 %v841_v51  ;;  %vm674_vm6 = vweird.f32 %v1353_v25 }
 0x1c0   :  { %v703_v58 = vadd.f32 %v835_v21, %v702_v53  ;;  %767 = vst.msk [vmem:[%s1436_s3 + $0x38] sm:$0xff] %vm759_vm1, %v637_v57  ;;  %v671_v61 = vsub.f32 1.0, %v670_v4  ;;  %v715_v7 = vmul.f32 %v843_v63, %v1363_v23  ;;  %vm676_vm7 = vmor %vm674_vm6, %vm675_vm5  ;;  %vm679_vm8 = vcmp.eq.f32.partialorder %v678_v0, 8.507059e+37 }
 0x1c1   :  { %v681_v59 = vor.u32 1.1754944e-38, %v680_v1  ;;  %v723_v56 = vand.u32 2147483647, %v1363_v23  ;;  %v725_v2 = vand.u32 2147483648, %v1363_v23  ;;  %vm720_vm9 = vweird.f32 %v843_v63 }
 0x1c2   :  { %v707_v10 = vsel %vm706_vm3, %v835_v21, %v703_v58  ;;  %v672_v9 = vmul.f32 %v841_v51, %v671_v61  ;;  %v716_v11 = vsub.f32 1.0, %v715_v7  ;;  %vm719_vm10 = vweird.f32 %v1363_v23 }
 0x1c3   :  { %v712_v6 = vsel %vm709_vm4, %v711_v49, %v707_v10  ;;  %v845_v12 = vpop.eup %844  ;;  %vm721_vm11 = vmor %vm719_vm10, %vm720_vm9  ;;  %vm724_vm12 = vcmp.eq.f32.partialorder %v723_v56, 8.507059e+37  ;;  %v726_v20 = vor.u32 1.1754944e-38, %v725_v2  ;;  %v738_v16 = vand.u32 2147483647, %v1386_v19 }
 0x1c4   :  { %772 = vst.msk [vmem:[%s1436_s3 + $0x60] sm:$0xff] %vm759_vm1, %v712_v6  ;;  %v673_v3 = vadd.f32 %v841_v51, %v672_v9  ;;  %v717_v15 = vmul.f32 %v843_v63, %v716_v11  ;;  %v730_v8 = vmul.f32 %v845_v12, %v1386_v19  ;;  %v740_v5 = vand.u32 2147483648, %v1386_v19 }
 0x1c5   :  { %v847_v17 = vpop.eup %846  ;;  %vm735_vm13 = vweird.f32 %v845_v12  ;;  %vm734_vm14 = vweird.f32 %v1386_v19  ;;  %v755_v26 = vand.u32 2147483648, %v1388_v54  ;;  %v753_v29 = vand.u32 2147483647, %v1388_v54 }
 0x1c6   :  { %v677_v14 = vsel %vm676_vm7, %v841_v51, %v673_v3  ;;  %v718_v60 = vadd.f32 %v843_v63, %v717_v15  ;;  %v731_v55 = vsub.f32 1.0, %v730_v8  ;;  %v745_v45 = vmul.f32 %v847_v17, %v1388_v54  ;;  %vm736_vm0 = vmor %vm734_vm14, %vm735_vm13 }
 0x1c7   :  { %v682_v52 = vsel %vm679_vm8, %v681_v59, %v677_v14  ;;  %vm750_vm15 = vweird.f32 %v847_v17  ;;  %v741_v30 = vor.u32 1.1754944e-38, %v740_v5  ;;  %vm739_vm2 = vcmp.eq.f32.partialorder %v738_v16, 8.507059e+37 }
 0x1c8   :  { %770 = vst.msk [vmem:[%s1436_s3 + $0x50] sm:$0xff] %vm759_vm1, %v682_v52  ;;  %v722_v13 = vsel %vm721_vm11, %v843_v63, %v718_v60  ;;  %v732_v22 = vmul.f32 %v845_v12, %v731_v55  ;;  %v746_v24 = vsub.f32 1.0, %v745_v45  ;;  %vm749_vm3 = vweird.f32 %v1388_v54 }
 0x1c9   :  { %v727_v25 = vsel %vm724_vm12, %v726_v20, %v722_v13  ;;  %vm751_vm4 = vmor %vm749_vm3, %vm750_vm15  ;;  %v756_v35 = vor.u32 1.1754944e-38, %v755_v26  ;;  %vm754_vm5 = vcmp.eq.f32.partialorder %v753_v29, 8.507059e+37 }
 0x1ca   :  { %773 = vst.msk [vmem:[%s1436_s3 + $0x68] sm:$0xff] %vm759_vm1, %v727_v25  ;;  %v733_v27 = vadd.f32 %v845_v12, %v732_v22  ;;  %v747_v28 = vmul.f32 %v847_v17, %v746_v24 }
 0x1cc   :  { %v737_v32 = vsel %vm736_vm0, %v845_v12, %v733_v27  ;;  %v748_v21 = vadd.f32 %v847_v17, %v747_v28 }
 0x1cd   :  { %v742_v34 = vsel %vm739_vm2, %v741_v30, %v737_v32 }
 0x1ce   :  { %774 = vst.msk [vmem:[%s1436_s3 + $0x70] sm:$0xff] %vm759_vm1, %v742_v34  ;;  %v752_v37 = vsel %vm751_vm4, %v847_v17, %v748_v21 }
 0x1cf   :  { %v757_v23 = vsel %vm754_vm5, %v756_v35, %v752_v37 }
 0x1d0   :  { %775 = vst.msk [vmem:[%s1436_s3 + $0x78] sm:$0xff] %vm759_vm1, %v757_v23 }
 0x1d1   :  { %780 = vsyncpa [#allocation3], 1 }

</bundles_post_ra>
